<compile_context>
chip_gen: v7x
topology: tpu7x:2x2x1
jax: 0.10.0
libtpu: 0.0.40
codegen_flags: <defaults>
</compile_context>

<pallas_src>
import math
import functools

import jax
import jax.numpy as jnp
from jax.experimental import pallas as pl
from jax.experimental.pallas import tpu as pltpu


def _attention_kernel(q_ref, k_ref, v_ref, wqkv_ref, bqkv_ref, wo_ref, bo_ref,
                      o_ref, *, num_heads, head_dim, mxu_dtype):
    """One (batch-block, q-block) grid step.

    q_ref:    (bb, nq, E)   activations (caller dtype)
    k_ref:    (bb, nk, E)
    v_ref:    (bb, nk, E)
    wqkv_ref: (3, E, ID)    fused q/k/v projection weights (mxu_dtype)
    bqkv_ref: (3, 1, ID)    fused q/k/v projection biases (f32)
    wo_ref:   (ID, E)       output projection weight (mxu_dtype)
    bo_ref:   (1, E)        output projection bias (f32)
    o_ref:    (bb, nq, E)
    """
    H, dh = num_heads, head_dim
    scale = 1.0 / math.sqrt(dh)

    xq = q_ref[...].astype(mxu_dtype)
    xk = k_ref[...].astype(mxu_dtype)
    xv = v_ref[...].astype(mxu_dtype)

    # Full-width projections: one MXU pass each, contraction depth = E and
    # output width = internal_dim.  Fold 1/sqrt(dh) into Q (smallest tensor).
    Q = (jnp.einsum('bne,ed->bnd', xq, wqkv_ref[0],
                    preferred_element_type=jnp.float32) + bqkv_ref[0]) * scale
    K = jnp.einsum('bne,ed->bnd', xk, wqkv_ref[1],
                   preferred_element_type=jnp.float32) + bqkv_ref[1]
    V = jnp.einsum('bne,ed->bnd', xv, wqkv_ref[2],
                   preferred_element_type=jnp.float32) + bqkv_ref[2]

    Qm = Q.astype(mxu_dtype)
    Km = K.astype(mxu_dtype)
    Vm = V.astype(mxu_dtype)

    # Per-head attention core.  Heads are static lane slices of the projected
    # activations; each score / PV product is a single-batch-dim dot_general
    # on the MXU (trailing-dim contraction, no explicit K transpose).
    # Softmax element-wise math stays in f32.
    # TODO(synk): for production SAM (Nk up to 4096) tile Nk on a trailing
    # "arbitrary" grid axis with an online (flash) softmax instead of
    # materialising the (bb, nq, nk) score tile per head.
    head_outs = []
    for h in range(H):                                   # static unroll, H small
        lo, hi = h * dh, (h + 1) * dh
        s = jnp.einsum('bqd,bkd->bqk', Qm[:, :, lo:hi], Km[:, :, lo:hi],
                       preferred_element_type=jnp.float32)
        s = s - jnp.max(s, axis=-1, keepdims=True)
        p = jnp.exp(s)
        p = p * pl.reciprocal(jnp.sum(p, axis=-1, keepdims=True), approx=False)
        head_outs.append(
            jnp.einsum('bqk,bkd->bqd', p.astype(mxu_dtype), Vm[:, :, lo:hi],
                       preferred_element_type=jnp.float32))

    # Recombine heads on the lane axis, then ONE output projection with
    # contraction depth = internal_dim (instead of H depth-dh partials).
    o_cat = jnp.concatenate(head_outs, axis=-1).astype(mxu_dtype)   # (bb,nq,ID)
    out = jnp.einsum('bqi,ie->bqe', o_cat, wo_ref[...],
                     preferred_element_type=jnp.float32) + bo_ref[...]

    # TODO(synk): for E < 128 this store is lane-sparse (masked vst); a
    # lane-dense (bb, nq*E) output slab would remove the masking.
    o_ref[...] = out.astype(o_ref.dtype)


def _per_batch_bytes(Nq, Nk, E, ID):
    """Rough f32 working-set per batch element (activations + intermediates)."""
    return (Nq * E + 2 * Nk * E            # q/k/v activation tiles
            + Nq * ID + 2 * Nk * ID        # projected Q/K/V
            + Nq * Nk                      # one head's score tile
            + 2 * Nq * E) * 4              # recombined heads + output


def _pick_batch_block(B, per_batch_bytes):
    """Largest divisor of B that keeps >=2 grid steps when B >= 2 (pipelining /
    second TensorCore) and a modest per-step working set (v5e's scoped VMEM
    default is only 16 MiB)."""
    budget = 8 << 20
    blk = min(B, max(1, budget // max(per_batch_bytes, 1)))
    if B >= 2:
        blk = min(blk, B // 2)
    blk = max(blk, 1)
    while B % blk:
        blk -= 1
    return blk


def _pick_q_block(Nq, num_batch_blocks):
    """Split Nq onto a second 'parallel' axis when the batch axis alone cannot
    feed two TensorCores (v7x).  Blocks must stay (8, *)-aligned."""
    if num_batch_blocks == 1 and Nq % 16 == 0:
        return Nq // 2
    return Nq


def _vmem_limit_bytes(block_b, per_batch_bytes, E, ID):
    weights = (3 * E * ID + 3 * ID + ID * E + E) * 4
    need = 4 * block_b * per_batch_bytes + 2 * weights   # generous headroom
    # Above the 16/32 MiB scoped defaults, never above v7x's 64 MiB physical.
    return int(min(max(need, 32 << 20), 64 << 20))


def attention_pallas(q, k, v, params, *, num_heads,
                     batch_block=None, q_block=None, mxu_dtype=jnp.bfloat16):
    """q: (B, Nq, E); k, v: (B, Nk, E). Returns (B, Nq, E)."""
    B, Nq, E = q.shape
    _, Nk, _ = k.shape
    wq, bq, wk, bk, wv, bv, wo, bo = params
    internal_dim = wq.shape[1]
    head_dim = internal_dim // num_heads
    ID = internal_dim

    # Fused weight/bias slabs (wrapper-side, static): 7 input DMAs total.
    wqkv = jnp.stack([wq, wk, wv], axis=0).astype(mxu_dtype)        # (3, E, ID)
    bqkv = jnp.stack([bq, bk, bv], axis=0).reshape(3, 1, ID)        # (3, 1, ID) f32
    wo_m = wo.astype(mxu_dtype)                                     # (ID, E)
    bo_m = bo.reshape(1, E)                                         # (1, E) f32

    per_b = _per_batch_bytes(Nq, Nk, E, ID)
    block_b = batch_block if batch_block is not None else _pick_batch_block(B, per_b)
    assert B % block_b == 0, "batch_block must divide batch"
    num_b_blocks = B // block_b

    q_blk = q_block if q_block is not None else _pick_q_block(Nq, num_b_blocks)
    assert Nq % q_blk == 0 and (q_blk == Nq or q_blk % 8 == 0), "bad q_block"
    num_q_blocks = Nq // q_blk

    kernel = functools.partial(_attention_kernel, num_heads=num_heads,
                               head_dim=head_dim, mxu_dtype=mxu_dtype)

    return pl.pallas_call(
        kernel,
        out_shape=jax.ShapeDtypeStruct((B, Nq, E), q.dtype),
        grid=(num_b_blocks, num_q_blocks),
        in_specs=[
            pl.BlockSpec((block_b, q_blk, E), lambda i, j: (i, j, 0)),   # q
            pl.BlockSpec((block_b, Nk, E), lambda i, j: (i, 0, 0)),      # k
            pl.BlockSpec((block_b, Nk, E), lambda i, j: (i, 0, 0)),      # v
            pl.BlockSpec((3, E, ID), lambda i, j: (0, 0, 0)),            # Wqkv
            pl.BlockSpec((3, 1, ID), lambda i, j: (0, 0, 0)),            # bqkv
            pl.BlockSpec((ID, E), lambda i, j: (0, 0)),                  # Wo
            pl.BlockSpec((1, E), lambda i, j: (0, 0)),                   # bo
        ],
        out_specs=pl.BlockSpec((block_b, q_blk, E), lambda i, j: (i, j, 0)),
        compiler_params=pltpu.CompilerParams(
            dimension_semantics=("parallel", "parallel"),
            vmem_limit_bytes=_vmem_limit_bytes(block_b, per_b, E, ID)),
    )(q, k, v, wqkv, bqkv, wo_m, bo_m)


def attention_reference(q, k, v, params, *, num_heads):
    """Pure-JAX f32 reference mirroring the PyTorch forward exactly."""
    wq, bq, wk, bk, wv, bv, wo, bo = params
    B, Nq, _ = q.shape
    _, Nk, _ = k.shape
    internal_dim = wq.shape[1]
    dh = internal_dim // num_heads

    def sep(x):
        b, t, c = x.shape
        return x.reshape(b, t, num_heads, c // num_heads).transpose(0, 2, 1, 3)

    Q = sep(q @ wq + bq)
    K = sep(k @ wk + bk)
    V = sep(v @ wv + bv)
    attn = jnp.einsum("bhqd,bhkd->bhqk", Q, K) / math.sqrt(dh)
    attn = jax.nn.softmax(attn, axis=-1)
    out = jnp.einsum("bhqk,bhkd->bhqd", attn, V)
    out = out.transpose(0, 2, 1, 3).reshape(B, Nq, internal_dim)
    return out @ wo + bo


def init_params(key, embedding_dim, internal_dim):
    ks = jax.random.split(key, 8)
    s_in = 1.0 / math.sqrt(embedding_dim)
    s_int = 1.0 / math.sqrt(internal_dim)
    wq = jax.random.uniform(ks[0], (embedding_dim, internal_dim), jnp.float32, -s_in, s_in)
    bq = jax.random.uniform(ks[1], (internal_dim,), jnp.float32, -s_in, s_in)
    wk = jax.random.uniform(ks[2], (embedding_dim, internal_dim), jnp.float32, -s_in, s_in)
    bk = jax.random.uniform(ks[3], (internal_dim,), jnp.float32, -s_in, s_in)
    wv = jax.random.uniform(ks[4], (embedding_dim, internal_dim), jnp.float32, -s_in, s_in)
    bv = jax.random.uniform(ks[5], (internal_dim,), jnp.float32, -s_in, s_in)
    wo = jax.random.uniform(ks[6], (internal_dim, embedding_dim), jnp.float32, -s_int, s_int)
    bo = jax.random.uniform(ks[7], (embedding_dim,), jnp.float32, -s_int, s_int)
    return (wq, bq, wk, bk, wv, bv, wo, bo)


if __name__ == "__main__":
    # Module config: embedding_dim=32, num_heads=4, downsample_rate=2
    embedding_dim = 32
    num_heads = 4
    downsample_rate = 2
    internal_dim = embedding_dim // downsample_rate   # 16 -> head_dim = 4

    B, Nq, Nk = 2, 8, 16

    key = jax.random.PRNGKey(0)
    kq, kk, kv, kp = jax.random.split(key, 4)
    q = jax.random.normal(kq, (B, Nq, embedding_dim), jnp.float32)
    k = jax.random.normal(kk, (B, Nk, embedding_dim), jnp.float32)
    v = jax.random.normal(kv, (B, Nk, embedding_dim), jnp.float32)
    params = init_params(kp, embedding_dim, internal_dim)

    out = attention_pallas(q, k, v, params, num_heads=num_heads)
    out = jax.block_until_ready(out)

    ref = attention_reference(q, k, v, params, num_heads=num_heads)
    assert out.shape == (B, Nq, embedding_dim)
    # bf16 MXU operands (f32 accumulation) -> compare with a bf16-level tolerance.
    assert jnp.allclose(out, ref, atol=4e-2, rtol=4e-2), "mismatch vs reference"

    print("KERNEL_OK")
</pallas_src>

<mosaic_0001>
module attributes {stable_mosaic.version = 11 : i64} {
  func.func @_attention_kernel(%arg0: i32, %arg1: i32, %arg2: memref<1x8x32xf32, #tpu.memory_space<vmem>>, %arg3: memref<1x16x32xf32, #tpu.memory_space<vmem>>, %arg4: memref<1x16x32xf32, #tpu.memory_space<vmem>>, %arg5: memref<3x32x16xbf16, #tpu.memory_space<vmem>>, %arg6: memref<3x1x16xf32, #tpu.memory_space<vmem>>, %arg7: memref<16x32xbf16, #tpu.memory_space<vmem>>, %arg8: memref<1x32xf32, #tpu.memory_space<vmem>>, %arg9: memref<1x8x32xf32, #tpu.memory_space<vmem>>) attributes {dimension_semantics = [#tpu.dimension_semantics<parallel>, #tpu.dimension_semantics<parallel>], iteration_bounds = array<i64: 2, 1>, scalar_prefetch = 0 : i64, scratch_operands = 0 : i64, tpu.core_type = #tpu.core_type<tc>, window_params = [{transform_indices = @transform_0, window_bounds = array<i64: 1, 8, 32>}, {transform_indices = @transform_1, window_bounds = array<i64: 1, 16, 32>}, {transform_indices = @transform_2, window_bounds = array<i64: 1, 16, 32>}, {pipeline_mode = #tpu.pipeline_mode<synchronous>, transform_indices = @transform_3, window_bounds = array<i64: 3, 32, 16>}, {pipeline_mode = #tpu.pipeline_mode<synchronous>, transform_indices = @transform_4, window_bounds = array<i64: 3, 1, 16>}, {pipeline_mode = #tpu.pipeline_mode<synchronous>, transform_indices = @transform_5, window_bounds = array<i64: 16, 32>}, {pipeline_mode = #tpu.pipeline_mode<synchronous>, transform_indices = @transform_6, window_bounds = array<i64: 1, 32>}, {transform_indices = @transform_7, window_bounds = array<i64: 1, 8, 32>}]} {
    %c0 = arith.constant 0 : index
    %c0_0 = arith.constant 0 : index
    %c0_1 = arith.constant 0 : index
    %0 = vector.load %arg2[%c0, %c0_0, %c0_1] : memref<1x8x32xf32, #tpu.memory_space<vmem>>, vector<1x8x32xf32>
    %1 = arith.truncf %0 : vector<1x8x32xf32> to vector<1x8x32xbf16>
    %c0_2 = arith.constant 0 : index
    %c0_3 = arith.constant 0 : index
    %c0_4 = arith.constant 0 : index
    %2 = vector.load %arg3[%c0_2, %c0_3, %c0_4] : memref<1x16x32xf32, #tpu.memory_space<vmem>>, vector<1x16x32xf32>
    %3 = arith.truncf %2 : vector<1x16x32xf32> to vector<1x16x32xbf16>
    %c0_5 = arith.constant 0 : index
    %c0_6 = arith.constant 0 : index
    %c0_7 = arith.constant 0 : index
    %4 = vector.load %arg4[%c0_5, %c0_6, %c0_7] : memref<1x16x32xf32, #tpu.memory_space<vmem>>, vector<1x16x32xf32>
    %5 = arith.truncf %4 : vector<1x16x32xf32> to vector<1x16x32xbf16>
    %c0_8 = arith.constant 0 : index
    %c0_9 = arith.constant 0 : index
    %c0_10 = arith.constant 0 : index
    %6 = vector.load %arg5[%c0_8, %c0_9, %c0_10] : memref<3x32x16xbf16, #tpu.memory_space<vmem>>, vector<1x32x16xbf16>
    %7 = vector.shape_cast %6 : vector<1x32x16xbf16> to vector<32x16xbf16>
    "tpu.trace_start"() <{level = 10 : i32, message = "bne,ed->bnd"}> : () -> ()
    %cst = arith.constant dense<0.000000e+00> : vector<1x8x16xf32>
    %8 = tpu.matmul %1, %7, %cst {dimension_numbers = #tpu.dot_dimension_numbers<[2], [0], [0, 1], [1], [0, 0, 0, 1, 1, 1], [], []>} : vector<1x8x32xbf16>, vector<32x16xbf16>, vector<1x8x16xf32> -> vector<1x8x16xf32>
    "tpu.trace_stop"() : () -> ()
    %c0_11 = arith.constant 0 : index
    %c0_12 = arith.constant 0 : index
    %c0_13 = arith.constant 0 : index
    %9 = vector.load %arg6[%c0_11, %c0_12, %c0_13] : memref<3x1x16xf32, #tpu.memory_space<vmem>>, vector<1x1x16xf32>
    %10 = vector.shape_cast %9 : vector<1x1x16xf32> to vector<1x16xf32>
    %11 = vector.shape_cast %10 : vector<1x16xf32> to vector<1x1x16xf32>
    %12 = vector.broadcast %11 : vector<1x1x16xf32> to vector<1x8x16xf32>
    %13 = arith.addf %8, %12 : vector<1x8x16xf32>
    %cst_14 = arith.constant 5.000000e-01 : f32
    %14 = vector.broadcast %cst_14 : f32 to vector<1x8x16xf32>
    %15 = arith.mulf %13, %14 : vector<1x8x16xf32>
    %c1 = arith.constant 1 : index
    %c0_15 = arith.constant 0 : index
    %c0_16 = arith.constant 0 : index
    %16 = vector.load %arg5[%c1, %c0_15, %c0_16] : memref<3x32x16xbf16, #tpu.memory_space<vmem>>, vector<1x32x16xbf16>
    %17 = vector.shape_cast %16 : vector<1x32x16xbf16> to vector<32x16xbf16>
    "tpu.trace_start"() <{level = 10 : i32, message = "bne,ed->bnd"}> : () -> ()
    %cst_17 = arith.constant dense<0.000000e+00> : vector<1x16x16xf32>
    %18 = tpu.matmul %3, %17, %cst_17 {dimension_numbers = #tpu.dot_dimension_numbers<[2], [0], [0, 1], [1], [0, 0, 0, 1, 1, 1], [], []>} : vector<1x16x32xbf16>, vector<32x16xbf16>, vector<1x16x16xf32> -> vector<1x16x16xf32>
    "tpu.trace_stop"() : () -> ()
    %c1_18 = arith.constant 1 : index
    %c0_19 = arith.constant 0 : index
    %c0_20 = arith.constant 0 : index
    %19 = vector.load %arg6[%c1_18, %c0_19, %c0_20] : memref<3x1x16xf32, #tpu.memory_space<vmem>>, vector<1x1x16xf32>
    %20 = vector.shape_cast %19 : vector<1x1x16xf32> to vector<1x16xf32>
    %21 = vector.shape_cast %20 : vector<1x16xf32> to vector<1x1x16xf32>
    %22 = vector.broadcast %21 : vector<1x1x16xf32> to vector<1x16x16xf32>
    %23 = arith.addf %18, %22 : vector<1x16x16xf32>
    %c2 = arith.constant 2 : index
    %c0_21 = arith.constant 0 : index
    %c0_22 = arith.constant 0 : index
    %24 = vector.load %arg5[%c2, %c0_21, %c0_22] : memref<3x32x16xbf16, #tpu.memory_space<vmem>>, vector<1x32x16xbf16>
    %25 = vector.shape_cast %24 : vector<1x32x16xbf16> to vector<32x16xbf16>
    "tpu.trace_start"() <{level = 10 : i32, message = "bne,ed->bnd"}> : () -> ()
    %cst_23 = arith.constant dense<0.000000e+00> : vector<1x16x16xf32>
    %26 = tpu.matmul %5, %25, %cst_23 {dimension_numbers = #tpu.dot_dimension_numbers<[2], [0], [0, 1], [1], [0, 0, 0, 1, 1, 1], [], []>} : vector<1x16x32xbf16>, vector<32x16xbf16>, vector<1x16x16xf32> -> vector<1x16x16xf32>
    "tpu.trace_stop"() : () -> ()
    %c2_24 = arith.constant 2 : index
    %c0_25 = arith.constant 0 : index
    %c0_26 = arith.constant 0 : index
    %27 = vector.load %arg6[%c2_24, %c0_25, %c0_26] : memref<3x1x16xf32, #tpu.memory_space<vmem>>, vector<1x1x16xf32>
    %28 = vector.shape_cast %27 : vector<1x1x16xf32> to vector<1x16xf32>
    %29 = vector.shape_cast %28 : vector<1x16xf32> to vector<1x1x16xf32>
    %30 = vector.broadcast %29 : vector<1x1x16xf32> to vector<1x16x16xf32>
    %31 = arith.addf %26, %30 : vector<1x16x16xf32>
    %32 = arith.truncf %15 : vector<1x8x16xf32> to vector<1x8x16xbf16>
    %33 = arith.truncf %23 : vector<1x16x16xf32> to vector<1x16x16xbf16>
    %34 = arith.truncf %31 : vector<1x16x16xf32> to vector<1x16x16xbf16>
    %35 = vector.extract_strided_slice %32 {offsets = [0, 0, 0], sizes = [1, 8, 4], strides = [1, 1, 1]} : vector<1x8x16xbf16> to vector<1x8x4xbf16>
    %36 = vector.extract_strided_slice %33 {offsets = [0, 0, 0], sizes = [1, 16, 4], strides = [1, 1, 1]} : vector<1x16x16xbf16> to vector<1x16x4xbf16>
    "tpu.trace_start"() <{level = 10 : i32, message = "bqd,bkd->bqk"}> : () -> ()
    %cst_27 = arith.constant dense<0.000000e+00> : vector<1x8x16xf32>
    %37 = tpu.matmul %35, %36, %cst_27 {dimension_numbers = #tpu.dot_dimension_numbers<[2], [2], [1], [1], [0, 0, 0, 1, 1, 1], [0], [0]>} : vector<1x8x4xbf16>, vector<1x16x4xbf16>, vector<1x8x16xf32> -> vector<1x8x16xf32>
    "tpu.trace_stop"() : () -> ()
    %cst_28 = arith.constant dense<0xFF800000> : vector<1x8xf32>
    %38 = vector.multi_reduction <maximumf>, %37, %cst_28 [2] : vector<1x8x16xf32> to vector<1x8xf32>
    %39 = vector.shape_cast %38 : vector<1x8xf32> to vector<1x8x1xf32>
    %40 = vector.broadcast %39 : vector<1x8x1xf32> to vector<1x8x16xf32>
    %41 = arith.subf %37, %40 : vector<1x8x16xf32>
    %42 = math.exp %41 : vector<1x8x16xf32>
    %cst_29 = arith.constant dense<0.000000e+00> : vector<1x8xf32>
    %43 = vector.multi_reduction <add>, %42, %cst_29 [2] : vector<1x8x16xf32> to vector<1x8xf32>
    %44 = vector.shape_cast %43 : vector<1x8xf32> to vector<1x8x1xf32>
    %45 = tpu.reciprocal %44 : vector<1x8x1xf32> -> vector<1x8x1xf32>
    %46 = vector.broadcast %45 : vector<1x8x1xf32> to vector<1x8x16xf32>
    %47 = arith.mulf %42, %46 : vector<1x8x16xf32>
    %48 = arith.truncf %47 : vector<1x8x16xf32> to vector<1x8x16xbf16>
    %49 = vector.extract_strided_slice %34 {offsets = [0, 0, 0], sizes = [1, 16, 4], strides = [1, 1, 1]} : vector<1x16x16xbf16> to vector<1x16x4xbf16>
    "tpu.trace_start"() <{level = 10 : i32, message = "bqk,bkd->bqd"}> : () -> ()
    %cst_30 = arith.constant dense<0.000000e+00> : vector<1x8x4xf32>
    %50 = tpu.matmul %48, %49, %cst_30 {dimension_numbers = #tpu.dot_dimension_numbers<[2], [1], [1], [2], [0, 0, 0, 1, 1, 2], [0], [0]>} : vector<1x8x16xbf16>, vector<1x16x4xbf16>, vector<1x8x4xf32> -> vector<1x8x4xf32>
    "tpu.trace_stop"() : () -> ()
    %51 = vector.extract_strided_slice %32 {offsets = [0, 0, 4], sizes = [1, 8, 4], strides = [1, 1, 1]} : vector<1x8x16xbf16> to vector<1x8x4xbf16>
    %52 = vector.extract_strided_slice %33 {offsets = [0, 0, 4], sizes = [1, 16, 4], strides = [1, 1, 1]} : vector<1x16x16xbf16> to vector<1x16x4xbf16>
    "tpu.trace_start"() <{level = 10 : i32, message = "bqd,bkd->bqk"}> : () -> ()
    %cst_31 = arith.constant dense<0.000000e+00> : vector<1x8x16xf32>
    %53 = tpu.matmul %51, %52, %cst_31 {dimension_numbers = #tpu.dot_dimension_numbers<[2], [2], [1], [1], [0, 0, 0, 1, 1, 1], [0], [0]>} : vector<1x8x4xbf16>, vector<1x16x4xbf16>, vector<1x8x16xf32> -> vector<1x8x16xf32>
    "tpu.trace_stop"() : () -> ()
    %cst_32 = arith.constant dense<0xFF800000> : vector<1x8xf32>
    %54 = vector.multi_reduction <maximumf>, %53, %cst_32 [2] : vector<1x8x16xf32> to vector<1x8xf32>
    %55 = vector.shape_cast %54 : vector<1x8xf32> to vector<1x8x1xf32>
    %56 = vector.broadcast %55 : vector<1x8x1xf32> to vector<1x8x16xf32>
    %57 = arith.subf %53, %56 : vector<1x8x16xf32>
    %58 = math.exp %57 : vector<1x8x16xf32>
    %cst_33 = arith.constant dense<0.000000e+00> : vector<1x8xf32>
    %59 = vector.multi_reduction <add>, %58, %cst_33 [2] : vector<1x8x16xf32> to vector<1x8xf32>
    %60 = vector.shape_cast %59 : vector<1x8xf32> to vector<1x8x1xf32>
    %61 = tpu.reciprocal %60 : vector<1x8x1xf32> -> vector<1x8x1xf32>
    %62 = vector.broadcast %61 : vector<1x8x1xf32> to vector<1x8x16xf32>
    %63 = arith.mulf %58, %62 : vector<1x8x16xf32>
    %64 = arith.truncf %63 : vector<1x8x16xf32> to vector<1x8x16xbf16>
    %65 = vector.extract_strided_slice %34 {offsets = [0, 0, 4], sizes = [1, 16, 4], strides = [1, 1, 1]} : vector<1x16x16xbf16> to vector<1x16x4xbf16>
    "tpu.trace_start"() <{level = 10 : i32, message = "bqk,bkd->bqd"}> : () -> ()
    %cst_34 = arith.constant dense<0.000000e+00> : vector<1x8x4xf32>
    %66 = tpu.matmul %64, %65, %cst_34 {dimension_numbers = #tpu.dot_dimension_numbers<[2], [1], [1], [2], [0, 0, 0, 1, 1, 2], [0], [0]>} : vector<1x8x16xbf16>, vector<1x16x4xbf16>, vector<1x8x4xf32> -> vector<1x8x4xf32>
    "tpu.trace_stop"() : () -> ()
    %67 = vector.extract_strided_slice %32 {offsets = [0, 0, 8], sizes = [1, 8, 4], strides = [1, 1, 1]} : vector<1x8x16xbf16> to vector<1x8x4xbf16>
    %68 = vector.extract_strided_slice %33 {offsets = [0, 0, 8], sizes = [1, 16, 4], strides = [1, 1, 1]} : vector<1x16x16xbf16> to vector<1x16x4xbf16>
    "tpu.trace_start"() <{level = 10 : i32, message = "bqd,bkd->bqk"}> : () -> ()
    %cst_35 = arith.constant dense<0.000000e+00> : vector<1x8x16xf32>
    %69 = tpu.matmul %67, %68, %cst_35 {dimension_numbers = #tpu.dot_dimension_numbers<[2], [2], [1], [1], [0, 0, 0, 1, 1, 1], [0], [0]>} : vector<1x8x4xbf16>, vector<1x16x4xbf16>, vector<1x8x16xf32> -> vector<1x8x16xf32>
    "tpu.trace_stop"() : () -> ()
    %cst_36 = arith.constant dense<0xFF800000> : vector<1x8xf32>
    %70 = vector.multi_reduction <maximumf>, %69, %cst_36 [2] : vector<1x8x16xf32> to vector<1x8xf32>
    %71 = vector.shape_cast %70 : vector<1x8xf32> to vector<1x8x1xf32>
    %72 = vector.broadcast %71 : vector<1x8x1xf32> to vector<1x8x16xf32>
    %73 = arith.subf %69, %72 : vector<1x8x16xf32>
    %74 = math.exp %73 : vector<1x8x16xf32>
    %cst_37 = arith.constant dense<0.000000e+00> : vector<1x8xf32>
    %75 = vector.multi_reduction <add>, %74, %cst_37 [2] : vector<1x8x16xf32> to vector<1x8xf32>
    %76 = vector.shape_cast %75 : vector<1x8xf32> to vector<1x8x1xf32>
    %77 = tpu.reciprocal %76 : vector<1x8x1xf32> -> vector<1x8x1xf32>
    %78 = vector.broadcast %77 : vector<1x8x1xf32> to vector<1x8x16xf32>
    %79 = arith.mulf %74, %78 : vector<1x8x16xf32>
    %80 = arith.truncf %79 : vector<1x8x16xf32> to vector<1x8x16xbf16>
    %81 = vector.extract_strided_slice %34 {offsets = [0, 0, 8], sizes = [1, 16, 4], strides = [1, 1, 1]} : vector<1x16x16xbf16> to vector<1x16x4xbf16>
    "tpu.trace_start"() <{level = 10 : i32, message = "bqk,bkd->bqd"}> : () -> ()
    %cst_38 = arith.constant dense<0.000000e+00> : vector<1x8x4xf32>
    %82 = tpu.matmul %80, %81, %cst_38 {dimension_numbers = #tpu.dot_dimension_numbers<[2], [1], [1], [2], [0, 0, 0, 1, 1, 2], [0], [0]>} : vector<1x8x16xbf16>, vector<1x16x4xbf16>, vector<1x8x4xf32> -> vector<1x8x4xf32>
    "tpu.trace_stop"() : () -> ()
    %83 = vector.extract_strided_slice %32 {offsets = [0, 0, 12], sizes = [1, 8, 4], strides = [1, 1, 1]} : vector<1x8x16xbf16> to vector<1x8x4xbf16>
    %84 = vector.extract_strided_slice %33 {offsets = [0, 0, 12], sizes = [1, 16, 4], strides = [1, 1, 1]} : vector<1x16x16xbf16> to vector<1x16x4xbf16>
    "tpu.trace_start"() <{level = 10 : i32, message = "bqd,bkd->bqk"}> : () -> ()
    %cst_39 = arith.constant dense<0.000000e+00> : vector<1x8x16xf32>
    %85 = tpu.matmul %83, %84, %cst_39 {dimension_numbers = #tpu.dot_dimension_numbers<[2], [2], [1], [1], [0, 0, 0, 1, 1, 1], [0], [0]>} : vector<1x8x4xbf16>, vector<1x16x4xbf16>, vector<1x8x16xf32> -> vector<1x8x16xf32>
    "tpu.trace_stop"() : () -> ()
    %cst_40 = arith.constant dense<0xFF800000> : vector<1x8xf32>
    %86 = vector.multi_reduction <maximumf>, %85, %cst_40 [2] : vector<1x8x16xf32> to vector<1x8xf32>
    %87 = vector.shape_cast %86 : vector<1x8xf32> to vector<1x8x1xf32>
    %88 = vector.broadcast %87 : vector<1x8x1xf32> to vector<1x8x16xf32>
    %89 = arith.subf %85, %88 : vector<1x8x16xf32>
    %90 = math.exp %89 : vector<1x8x16xf32>
    %cst_41 = arith.constant dense<0.000000e+00> : vector<1x8xf32>
    %91 = vector.multi_reduction <add>, %90, %cst_41 [2] : vector<1x8x16xf32> to vector<1x8xf32>
    %92 = vector.shape_cast %91 : vector<1x8xf32> to vector<1x8x1xf32>
    %93 = tpu.reciprocal %92 : vector<1x8x1xf32> -> vector<1x8x1xf32>
    %94 = vector.broadcast %93 : vector<1x8x1xf32> to vector<1x8x16xf32>
    %95 = arith.mulf %90, %94 : vector<1x8x16xf32>
    %96 = arith.truncf %95 : vector<1x8x16xf32> to vector<1x8x16xbf16>
    %97 = vector.extract_strided_slice %34 {offsets = [0, 0, 12], sizes = [1, 16, 4], strides = [1, 1, 1]} : vector<1x16x16xbf16> to vector<1x16x4xbf16>
    "tpu.trace_start"() <{level = 10 : i32, message = "bqk,bkd->bqd"}> : () -> ()
    %cst_42 = arith.constant dense<0.000000e+00> : vector<1x8x4xf32>
    %98 = tpu.matmul %96, %97, %cst_42 {dimension_numbers = #tpu.dot_dimension_numbers<[2], [1], [1], [2], [0, 0, 0, 1, 1, 2], [0], [0]>} : vector<1x8x16xbf16>, vector<1x16x4xbf16>, vector<1x8x4xf32> -> vector<1x8x4xf32>
    "tpu.trace_stop"() : () -> ()
    %99 = tpu.concatenate %50, %66, %82, %98 in 2 : vector<1x8x4xf32>, vector<1x8x4xf32>, vector<1x8x4xf32>, vector<1x8x4xf32> -> vector<1x8x16xf32>
    %100 = arith.truncf %99 : vector<1x8x16xf32> to vector<1x8x16xbf16>
    %c0_43 = arith.constant 0 : index
    %c0_44 = arith.constant 0 : index
    %101 = vector.load %arg7[%c0_43, %c0_44] : memref<16x32xbf16, #tpu.memory_space<vmem>>, vector<16x32xbf16>
    "tpu.trace_start"() <{level = 10 : i32, message = "bqi,ie->bqe"}> : () -> ()
    %cst_45 = arith.constant dense<0.000000e+00> : vector<1x8x32xf32>
    %102 = tpu.matmul %100, %101, %cst_45 {dimension_numbers = #tpu.dot_dimension_numbers<[2], [0], [0, 1], [1], [0, 0, 0, 1, 1, 1], [], []>} : vector<1x8x16xbf16>, vector<16x32xbf16>, vector<1x8x32xf32> -> vector<1x8x32xf32>
    "tpu.trace_stop"() : () -> ()
    %c0_46 = arith.constant 0 : index
    %c0_47 = arith.constant 0 : index
    %103 = vector.load %arg8[%c0_46, %c0_47] : memref<1x32xf32, #tpu.memory_space<vmem>>, vector<1x32xf32>
    %104 = vector.shape_cast %103 : vector<1x32xf32> to vector<1x1x32xf32>
    %105 = vector.broadcast %104 : vector<1x1x32xf32> to vector<1x8x32xf32>
    %106 = arith.addf %102, %105 : vector<1x8x32xf32>
    %c0_48 = arith.constant 0 : index
    %c0_49 = arith.constant 0 : index
    %c0_50 = arith.constant 0 : index
    %107 = vector.load %arg9[%c0_48, %c0_49, %c0_50] : memref<1x8x32xf32, #tpu.memory_space<vmem>>, vector<1x8x32xf32>
    tpu.vector_store %arg9[%c0_48, %c0_49, %c0_50], %106 {strides = array<i32>} : memref<1x8x32xf32, #tpu.memory_space<vmem>>, vector<1x8x32xf32>,
    return
  }
  func.func @transform_0(%arg0: i32, %arg1: i32) -> (i32, i32, i32) {
    %c0_i32 = arith.constant 0 : i32
    %c0_i32_0 = arith.constant 0 : i32
    return %arg0, %arg1, %c0_i32 : i32, i32, i32
  }
  func.func @transform_1(%arg0: i32, %arg1: i32) -> (i32, i32, i32) {
    %c0_i32 = arith.constant 0 : i32
    %c0_i32_0 = arith.constant 0 : i32
    %c0_i32_1 = arith.constant 0 : i32
    return %arg0, %c0_i32, %c0_i32_0 : i32, i32, i32
  }
  func.func @transform_2(%arg0: i32, %arg1: i32) -> (i32, i32, i32) {
    %c0_i32 = arith.constant 0 : i32
    %c0_i32_0 = arith.constant 0 : i32
    %c0_i32_1 = arith.constant 0 : i32
    return %arg0, %c0_i32, %c0_i32_0 : i32, i32, i32
  }
  func.func @transform_3(%arg0: i32, %arg1: i32) -> (i32, i32, i32) {
    %c0_i32 = arith.constant 0 : i32
    %c0_i32_0 = arith.constant 0 : i32
    %c0_i32_1 = arith.constant 0 : i32
    %c0_i32_2 = arith.constant 0 : i32
    return %c0_i32, %c0_i32_0, %c0_i32_1 : i32, i32, i32
  }
  func.func @transform_4(%arg0: i32, %arg1: i32) -> (i32, i32, i32) {
    %c0_i32 = arith.constant 0 : i32
    %c0_i32_0 = arith.constant 0 : i32
    %c0_i32_1 = arith.constant 0 : i32
    %c0_i32_2 = arith.constant 0 : i32
    return %c0_i32, %c0_i32_0, %c0_i32_1 : i32, i32, i32
  }
  func.func @transform_5(%arg0: i32, %arg1: i32) -> (i32, i32) {
    %c0_i32 = arith.constant 0 : i32
    %c0_i32_0 = arith.constant 0 : i32
    %c0_i32_1 = arith.constant 0 : i32
    return %c0_i32, %c0_i32_0 : i32, i32
  }
  func.func @transform_6(%arg0: i32, %arg1: i32) -> (i32, i32) {
    %c0_i32 = arith.constant 0 : i32
    %c0_i32_0 = arith.constant 0 : i32
    %c0_i32_1 = arith.constant 0 : i32
    return %c0_i32, %c0_i32_0 : i32, i32
  }
  func.func @transform_7(%arg0: i32, %arg1: i32) -> (i32, i32, i32) {
    %c0_i32 = arith.constant 0 : i32
    %c0_i32_0 = arith.constant 0 : i32
    return %arg0, %arg1, %c0_i32 : i32, i32, i32
  }
}

</mosaic_0001>

<bundles_post_ra>
// kernel: tpu_custom_call.1
= control target key start
LH: loop header
LB: loop body
LE: loop exit
PB: predicated region body
PF: predicated region fallthrough
CT: control target
= control target key end

     0   :  { %12 = vsyncpa [#allocation3], 0  ;;  %s1907_s0 = inlined_call_operand.hbm [shape: f32[2,8,32], index: 0, kind: input, shape index: {}]   ;;  %s1908_s1 = inlined_call_operand.vmem [shape: f32[2,16,32], index: 1, kind: input, shape index: {}]   ;;  %s1909_s2 = inlined_call_operand.vmem [shape: f32[2,16,32], index: 2, kind: input, shape index: {}]   ;;  %s1910_s3 = inlined_call_operand.vmem [shape: bf16[3,32,16], index: 3, kind: input, shape index: {}]   ;;  %s1911_s4 = inlined_call_operand.vmem [shape: f32[3,1,16], index: 4, kind: input, shape index: {}]   ;;  %s1912_s5 = inlined_call_operand.vmem [shape: bf16[16,32], index: 5, kind: input, shape index: {}]   ;;  %s1913_s6 = inlined_call_operand.vmem [shape: f32[1,32], index: 6, kind: input, shape index: {}]   ;;  %s1914_s7 = inlined_call_operand.hbm [shape: f32[2,8,32], index: 7, kind: output, shape index: {}]  }
   0x1   :  { %14 = vsyncpa [#allocation3 + $0x1], 0 }
   0x2   :  { %15 = vsyncpa [#allocation4], 0 }
   0x3   :  { %17 = vsyncpa [#allocation4 + $0x1], 0  ;;  %s1609_s24 = smov 0   ;;  %s1611_s25 = smov 0  }
   0x4   :  { %s1613_s26 = smov 0   ;;  %s1615_s27 = smov 0  }
   0x5   :  { %s1617_s28 = smov 0   ;;  %s1619_s29 = smov 0  }
   0x6 LB: > { %s1195_s30 = sadd.s32 4294967295, %s1557_s29   ;;  %s1196_s8 = sadd.s32 4294967294, %s1557_s29   ;;  %s1557_s29 = sphi %s1619_s29, %s23_s29   ;;  %s1553_s28 = sphi %s1617_s28, %s1932_s28   ;;  %s1549_s27 = sphi %s1615_s27, %s1931_s27   ;;  %s1545_s26 = sphi %s1613_s26, %s1930_s26   ;;  %s1541_s25 = sphi %s1611_s25, %s1929_s25   ;;  %s1537_s24 = sphi %s1609_s24, %s1928_s24  }
   0x7   : > { %s35_s9 = sadd.s32 1, %s1553_s28  ;;  %s44_s10 = sadd.s32 1, %s1545_s26 }
   0x8   : > { %p37_p0 = scmp.ge.s32.totalorder %s35_s9, 2  ;;  %p51_p1 = scmp.ne.s32.totalorder %s1545_s26, %s1541_s25 }
   0x9   : > { %p52_p2 = scmp.eq.s32.totalorder %s1557_s29, 0  ;;  %p57_p3 = scmp.ne.s32.totalorder %s1541_s25, %s1537_s24 }
   0xa   : > { %s1934_s9 = smov (%p37_p0, %s35_s9), 0  ;;  %p58_p5 = scmp.eq.s32.totalorder %s1195_s30, 0 }
   0xb   : > { %p1650_p4 = por %p52_p2, %p51_p1  ;;  %s39_s12 = ssub.s32 %s1553_s28, %s1934_s9 }
   0xc   : > { %p219_p6 = scmp.eq.s32.totalorder %s1195_s30, 1  ;;  %p42_p7 = scmp.eq.s32.totalorder %s39_s12, 0 }
   0xd   : > { %p1656_p8 = por %p58_p5, %p57_p3  ;;  %p225_p10 = scmp.eq.s32.totalorder %s1196_s8, 1 }
   0xe   : > { %p1660_p9 = por %p219_p6, %p51_p1  ;;  %p1364_p13 = scmp.lt.s32.totalorder %s1557_s29, 2 }
   0xf   : > { %s1665_s15 = scalar_select %p42_p7, %s1545_s26, %s44_s10  }
  0x10   : > { %s1919_s14 = scalar_select %p1660_p9, 1, 0 }
  0x11   : > { %p1667_p11 = por %p225_p10, %p57_p3  ;;  %s257_s17 = sand.u32 1, %s1545_s26  }
  0x12   : > { %s1199_s18 = sshll.u32 %s257_s17, 3  ;;  %s1200_s19 = sshll.u32 %s1553_s28, 7 }
  0x13   : > { %s1920_s16 = scalar_select %p1667_p11, 1, 0 }
  0x14   : > { %s1678_s22 = scalar_lea.hbm %s1907_s0, %s1200_s19  ;;  %s261_s23 = scalar_lea.vmem [#allocation2], %s1199_s18 }
  0x15   : > { %s269_s30 = sshll.u32 %s261_s23, 4  ;;  %p1684_p0 = pnand %p1364_p13, %p1650_p4  ;;  %s1680_s30 = int_to_ptr.vmem [resolvable:$true] %s269_s30 }
  0x16   : > { %s258_s10 = scalar_lea.sflag [#allocation3], %s257_s17  ;;  %s1445_s12 = scalar_lea.hbm %s1678_s22, 128 }
  0x17   : > { %p1446_p3 = scmp.ne.s32.totalorder %s1678_s22, %s1445_s12  ;;  %p1447_p5 = pneg %p1684_p0 }
  0x18   : > { %s1450_s11 = scalar_lea.hbm %s1907_s0, 256  ;;  %p1451_p4 = scmp.lt.u32.totalorder %s1678_s22, %s1907_s0 }
  0x19   : > { %p1448_p6 = pnand %p1447_p5, %p1446_p3  ;;  %p1452_p10 = scmp.lt.u32.totalorder %s1450_s11, %s1445_s12 }
  0x1a   : > { %p1454_p12 = scmp.lt.u32.totalorder %s1445_s12, %s1678_s22 }
  0x1b   : > { %p1449_p7 = pneg %p1448_p6  ;;  %p1453_p13 = por %p1452_p10, %p1451_p4 }
  0x1d   : > { %p1455_p1 = por %p1454_p12, %p1453_p13 }
  0x1f   : > { %p1456_p2 = pnand %p1455_p1, %p1449_p7 }
  0x21   : > { %1459 = shalt.err (!%p1456_p2)
}
  0x22   : > { %s1460_s17 = scalar_lea.vmem %s1680_s30, 128  ;;  %s1559_s23 = smov [#allocation2]  }
  0x23   : > { %p1461_p3 = scmp.ne.s32.totalorder %s1680_s30, %s1460_s17  ;;  %s1465_s18 = sshll.u32 %s1559_s23, 4  ;;  %s1466_s18 = int_to_ptr.vmem [resolvable:$false] %s1465_s18 }
  0x24   : > { %s1467_s19 = scalar_lea.vmem %s1466_s18, 256  ;;  %p1468_p9 = scmp.lt.s32.totalorder %s1680_s30, %s1466_s18 }
  0x25   : > { %p1463_p6 = pnand %p1461_p3, %p1447_p5  ;;  %p1469_p4 = scmp.lt.s32.totalorder %s1467_s19, %s1460_s17 }
  0x27   : > { %p1464_p11 = pneg %p1463_p6  ;;  %p1470_p10 = por %p1469_p4, %p1468_p9 }
  0x29   : > { %p1471_p12 = pnand %p1470_p10, %p1464_p11 }
  0x2b   : > { %1474 = shalt.err (!%p1471_p12)
}
  0x2c   : > { %1359 = dma.hbm_to_vmem [thread:$0]  (!%p1684_p0), %s1678_s22, 128, %s1680_s30, %s258_s10  }
  0x2d   : > { %p1922_p1 = scmp.lt.s32.totalorder %s1557_s29, 3  ;;  %p1923_p2 = scmp.ge.s32.totalorder %s1557_s29, 1 }
  0x2f   : > { %p291_p5 = pnand %p1923_p2, %p1922_p1 }
  0x30   : > { %s1720_s12 = sand.u32 (!%p291_p5), 1, %s1541_s25  }
  0x31   : > { %294 = sbr.rel (%p291_p5) target bundleno = 1510 (0x5e6), region = 48  ;;  %s1916_s11 = sshll.u32 (!%p291_p5), %s1720_s12, 3 }
  0x32   : > { %s297_s20 = scalar_lea.sflag (!%p291_p5), [#allocation3], %s1720_s12  ;;  %s300_s8 = scalar_lea.vmem (!%p291_p5), [#allocation2], %s1916_s11 }
  0x38   : > { %1528 = dma.done.wait (%p1656_p8), %s297_s20, 128  }
  0x39   : > { %1530 = vsyncadd (%p1656_p8), %s297_s20, 4294967168  ;;  %p341_p9 = scmp.lt.s32.totalorder %s1549_s27, 1  ;;  %v1560_v0 = vmov 0.0   ;;  %vm1561_vm0 = vmmov 0   ;;  %v1422_v1 = vld [vmem:[%s1910_s3 + $0x10] sm:$0xff]   ;;  %v1423_v2 = vld [vmem:[%s1910_s3] sm:$0xff]  }
  0x3a   : > { %1282 = vmatprep.subr.bf16.mxu1 %v1560_v0  ;;  %1274 = vmatprep.subr.bf16.mxu0 %v1560_v0  ;;  %v1424_v3 = vld [vmem:[%s1910_s3 + $0x18] sm:$0xff]   ;;  %vm383_vm1 = vcmask 261120   ;;  %v1425_v7 = vld [vmem:[%s1910_s3 + $0x8] sm:$0xff]   ;;  %v1208_v10 = vld [vmem:[%s1911_s4] ss:$0 sm:$0xff]  ;;  %vm569_vm2 = vcmask 31744  }
  0x3b   : > { %1286 = vmatprep.mubr.msk.bf16.mxu1 %vm1561_vm0, %v1560_v0  ;;  %s1736_s22 = scalar_select %p341_p9, %s1549_s27, 1  ;;  %1278 = vmatprep.mubr.msk.bf16.mxu0 %vm1561_vm0, %v1560_v0  ;;  %v352_v8 = vld [vmem:[%s300_s8] sm:$0xff]  ;;  %vm616_vm3 = vcmask 130048   ;;  %vm1012_vm4 = vcmask 64512   ;;  %vm1014_vm5 = vcmask 97280  }
  0x3c   : > { %1283 = vmatpush3.bf16.msra.mxu1 %v1422_v1  ;;  %1275 = vmatpush3.bf16.msra.mxu0 %v1423_v2  ;;  %v353_v9 = vpack.c.bf16 %v352_v8, %v352_v8  ;;  %v1217_v11 = vld [vmem:[%s1911_s4 + $0x1] ss:$0 sm:$0xff]  ;;  %s1563_s18 = smov 124   ;;  %s1564_s19 = smov 116   ;;  %v1427_v30 = vld [vmem:[%s1910_s3 + $0x28] sm:$0xff]  }
  0x3d   : > { %s1245_s13 = sshll.u32 %s1736_s22, 4  ;;  %1284 = vmatprep.subr.bf16.mxu1 %v1560_v0  ;;  %1276 = vmatprep.subr.bf16.mxu0 %v1560_v0  ;;  %v1426_v27 = vld [vmem:[%s1910_s3 + $0x20] sm:$0xff]   ;;  %s1566_s20 = smov 8  }
  0x3e   : > { %s345_s23 = scalar_lea.vmem %s1908_s1, %s1245_s13  ;;  %s350_s10 = scalar_lea.vmem %s1909_s2, %s1245_s13  ;;  %v1226_v46 = vld [vmem:[%s1911_s4 + $0x2] ss:$0 sm:$0xff] }
  0x3f   : > { %v354_v4 = vld [vmem:[%s345_s23] sm:$0xff]  ;;  %v355_v5 = vld [vmem:[%s345_s23 + $0x8] sm:$0xff]  ;;  %s1562_s23 = smov 120   ;;  %s1567_s30 = smov 12  }
  0x40   : > { %v356_v6 = vpack.c.bf16 %v355_v5, %v354_v4  ;;  %1285 = vmatpush3.bf16.msra.mxu1 %v1424_v3  ;;  %1277 = vmatpush3.bf16.msra.mxu0 %v1425_v7  ;;  %v357_v28 = vld [vmem:[%s350_s10] sm:$0xff]  ;;  %v358_v29 = vld [vmem:[%s350_s10 + $0x8] sm:$0xff]  ;;  %s1242_s21 = sshll.u32 %s1549_s27, 7  ;;  %s1924_s8 = sshll.u32 %s1720_s12, 3 }
  0x41   : > { %1298 = vmatprep.subr.bf16.mxu1 %v1560_v0  ;;  %1290 = vmatprep.subr.bf16.mxu0 %v1560_v0  ;;  %v359_v31 = vpack.c.bf16 %v358_v29, %v357_v28  ;;  %s340_s17 = scalar_lea.vmem [#allocation5], %s1924_s8  ;;  %s1077_s27 = scalar_lea.sflag [#allocation4], %s1720_s12 }
  0x42   : > { %s1091_s22 = sshll.u32 %s340_s17, 4  ;;  %p1925_p11 = scmp.ne.s32.totalorder %s1919_s14, 0  ;;  %s1859_s22 = int_to_ptr.vmem [resolvable:$true] %s1091_s22 }
  0x43   : > { %1287 = vmatmul.mubr.msk.bf16.vlgmr.msra.gmra.mrb[0].mxu1 %vm383_vm1, %v356_v6  ;;  %1279 = vmatmul.mubr.msk.bf16.vlgmr.msra.gmra.mrb[0].mxu0 %vm383_vm1, %v353_v9 }
  0x44   : > { %1300 = vmatprep.mubr.msk.bf16.mxu1 %vm1561_vm0, %v1560_v0  ;;  %1294 = vmatprep.mubr.msk.bf16.mxu0 %vm1561_vm0, %v1560_v0 }
  0x45   : > { %1291 = vmatpush3.bf16.msra.mxu0 %v1426_v27 }
  0x46   : > { %1292 = vmatprep.subr.bf16.mxu0 %v1560_v0 }
  0x49   : > { %1293 = vmatpush3.bf16.msra.mxu0 %v1427_v30 }
  0x4a   : > { %1304 = vmatprep.subr.bf16.mxu0 %v1560_v0 }
  0x4c   : > { %1295 = vmatmul.mubr.msk.bf16.vlgmr.msra.gmra.mrb[4].mxu0 %vm383_vm1, %v359_v31 }
  0x4d   : > { %1306 = vmatprep.mubr.msk.bf16.mxu0 %vm1561_vm0, %v1560_v0 }
 0x116   : > { %v490_v12 = vpop.f32.mrb[0].mxu1  ;;  %v421_v14 = vpop.f32.mrb[0].mxu0 }
 0x117   : > { %v1288_v13 = vpop.f32.mrb[1].mxu1  ;;  %v422_v16 = vadd.f32 %v1208_v10, %v421_v14  ;;  %v1280_v17 = vpop.f32.mrb[1].mxu0  ;;  %v491_v18 = vadd.f32 %v1217_v11, %v490_v12 }
 0x118   : > { %v493_v15 = vpop.f32.mrb[2].mxu1  ;;  %v424_v21 = vpop.f32.mrb[2].mxu0 }
 0x119   : > { %v494_v19 = vadd.f32 %v1217_v11, %v493_v15  ;;  %v1289_v20 = vpop.f32.mrb[3].mxu1  ;;  %v427_v22 = vmul.f32 0.5, %v422_v16  ;;  %v1281_v23 = vpop.f32.mrb[3].mxu0 }
 0x11b   : > { %v567_v24 = vpack.c.bf16 %v494_v19, %v491_v18  ;;  %v566_v25 = vpack.c.bf16 %v427_v22, %v427_v22 }
 0x11d   : > { %785 = vrot.lane.b32.xlu1 %v567_v24, %s1562_s23  ;;  %676 = vrot.lane.b32.xlu0 %v567_v24, %s1563_s18  ;;  %v574_v26 = vsel %vm569_vm2, %v567_v24, 0 }
 0x11e   : > { %1299 = vmatpush3.bf16.xpose.msra.mxu1 %v574_v26 }
 0x11f   : > { %1310 = vmatprep.subr.bf16.mxu1 %v1560_v0  ;;  %v559_v47 = vpop.f32.mrb[4].mxu0 }
 0x120   : > { %v560_v48 = vadd.f32 %v1226_v46, %v559_v47  ;;  %v1296_v49 = vpop.f32.mrb[5].mxu0 }
 0x121   : > { %783 = vrot.lane.b32.xlu1 %v566_v25, %s1562_s23  ;;  %673 = vrot.lane.b32.xlu0 %v566_v25, %s1563_s18  ;;  %v562_v50 = vpop.f32.mrb[6].mxu0 }
 0x122   : > { %v563_v51 = vadd.f32 %v1226_v46, %v562_v50  ;;  %v1297_v52 = vpop.f32.mrb[7].mxu0 }
 0x124   : > { %v568_v53 = vpack.c.bf16 %v563_v51, %v560_v48 }
 0x125   : > { %891 = vrot.lane.b32.xlu1 %v566_v25, %s1564_s19  ;;  %893 = vrot.lane.b32.xlu0 %v567_v24, %s1564_s19 }
 0x126   : > { %1301 = vmatmul.mubr.msk.bf16.vlgmr.msra.gmra.mrb[4].mxu1 %vm569_vm2, %v566_v25  ;;  %1305 = vmatpush3.bf16.msra.mxu0 %v568_v53 }
 0x127   : > { %1312 = vmatprep.mubr.msk.bf16.mxu1 %vm1561_vm0, %v1560_v0  ;;  %1316 = vmatprep.subr.bf16.mxu0 %v1560_v0 }
 0x18f   : > { %v677_v32 = vpop.permute.xlu0 %676  ;;  %v786_v34 = vpop.permute.xlu1 %785 }
 0x190   : > { %v682_v33 = vsel %vm569_vm2, %v677_v32, 0  ;;  %v791_v36 = vsel %vm569_vm2, %v786_v34, 0 }
 0x191   : > { %1311 = vmatpush3.bf16.xpose.msra.mxu1 %v682_v33 }
 0x192   : > { %1322 = vmatprep.subr.bf16.mxu1 %v1560_v0 }
 0x193   : > { %v674_v35 = vpop.permute.xlu0 %673  ;;  %v784_v38 = vpop.permute.xlu1 %783 }
 0x197   : > { %v894_v37 = vpop.permute.xlu0 %893  ;;  %v892_v40 = vpop.permute.xlu1 %891 }
 0x198   : > { %1313 = vmatmul.mubr.msk.bf16.vlgmr.msra.gmra.mrb[8].mxu1 %vm569_vm2, %v674_v35  ;;  %v899_v39 = vsel %vm569_vm2, %v894_v37, 0 }
 0x199   : > { %1323 = vmatpush3.bf16.xpose.msra.mxu1 %v791_v36  ;;  %1324 = vmatprep.mubr.msk.bf16.mxu1 %vm1561_vm0, %v1560_v0 }
 0x19a   : > { %1334 = vmatprep.subr.bf16.mxu1 %v1560_v0 }
 0x1a0   : > { %1325 = vmatmul.mubr.msk.bf16.vlgmr.msra.gmra.mrb[12].mxu1 %vm569_vm2, %v784_v38 }
 0x1a1   : > { %1335 = vmatpush3.bf16.xpose.msra.mxu1 %v899_v39  ;;  %1336 = vmatprep.mubr.msk.bf16.mxu1 %vm1561_vm0, %v1560_v0 }
 0x1a2   : > { %1346 = vmatprep.subr.bf16.mxu1 %v1560_v0 }
 0x1a8   : > { %1337 = vmatmul.mubr.msk.bf16.vlgmr.msra.gmra.mrb[16].mxu1 %vm569_vm2, %v892_v40 }
 0x1a9   : > { %1348 = vmatprep.mubr.msk.bf16.mxu1 %vm1561_vm0, %v1560_v0 }
 0x1f9   : > { %v610_v41 = vpop.f32.mrb[4].mxu1 }
 0x1fa   : > { %v1302_v42 = vpop.f32.mrb[5].mxu1  ;;  %v617_v43 = vsel %vm616_vm3, %v610_v41, -inf }
 0x1fb   : > { %618 = vmax.xlane.f32.xlu0 %v617_v43  ;;  %v613_v44 = vpop.f32.mrb[6].mxu1 }
 0x1fc   : > { %v1303_v45 = vpop.f32.mrb[7].mxu1 }
 0x26b   : > { %v718_v54 = vpop.f32.mrb[8].mxu1 }
 0x26c   : > { %v1314_v55 = vpop.f32.mrb[9].mxu1  ;;  %v724_v56 = vsel %vm616_vm3, %v718_v54, -inf }
 0x26d   : > { %725 = vmax.xlane.f32.xlu1 %v724_v56  ;;  %v721_v57 = vpop.f32.mrb[10].mxu1 }
 0x26e   : > { %v1315_v58 = vpop.f32.mrb[11].mxu1 }
 0x273   : > { %v827_v59 = vpop.f32.mrb[12].mxu1 }
 0x274   : > { %v1326_v60 = vpop.f32.mrb[13].mxu1  ;;  %v833_v61 = vsel %vm616_vm3, %v827_v59, -inf }
 0x275   : > { %834 = vmax.xlane.f32.xlu0 %v833_v61  ;;  %v830_v62 = vpop.f32.mrb[14].mxu1 }
 0x276   : > { %v1327_v63 = vpop.f32.mrb[15].mxu1 }
 0x27b   : > { %v935_v1 = vpop.f32.mrb[16].mxu1 }
 0x27c   : > { %v1338_v2 = vpop.f32.mrb[17].mxu1  ;;  %v941_v3 = vsel %vm616_vm3, %v935_v1, -inf }
 0x27d   : > { %942 = vmax.xlane.f32.xlu0 %v941_v3  ;;  %v938_v4 = vpop.f32.mrb[18].mxu1 }
 0x27e   : > { %v1339_v5 = vpop.f32.mrb[19].mxu1 }
 0x27f   : > { %v1238_v5 = vld [vmem:[%s1913_s6] ss:$0 sm:$0xff] }
 0x288   : > { %v619_v6 = vpop.xlane.xlu0 %618 }
 0x289   : > { %v620_v7 = vsub.f32 %v610_v41, %v619_v6 }
 0x28b   : > { %v621_v8 = vmul.f32 1.442695, %v620_v7 }
 0x28d   : > { %1429 = vpow2.f32 %v621_v8 }
 0x297   : > { %v1430_v9 = vpop.eup %1429 }
 0x298   : > { %v623_v10 = vsel %vm616_vm3, %v1430_v9, 0.0 }
 0x299   : > { %624 = vadd.xlane.f32.xlu1 %v623_v10 }
 0x2aa   : > { %737 = vrot.lane.b32.xlu1 %v568_v53, %s1563_s18  ;;  %s1857_s18 = scalar_lea.hbm %s1914_s7, %s1242_s21 }
 0x2fa   : > { %v726_v11 = vpop.xlane.xlu1 %725 }
 0x2fb   : > { %v727_v12 = vsub.f32 %v718_v54, %v726_v11 }
 0x2fd   : > { %v728_v13 = vmul.f32 1.442695, %v727_v12 }
 0x2ff   : > { %1431 = vpow2.f32 %v728_v13 }
 0x302   : > { %v835_v14 = vpop.xlane.xlu0 %834 }
 0x303   : > { %v836_v15 = vsub.f32 %v827_v59, %v835_v14 }
 0x305   : > { %v837_v16 = vmul.f32 1.442695, %v836_v15 }
 0x307   : > { %1433 = vpow2.f32 %v837_v16 }
 0x309   : > { %v1432_v17 = vpop.eup %1431 }
 0x30a   : > { %v943_v18 = vpop.xlane.xlu0 %942  ;;  %v730_v19 = vsel %vm616_vm3, %v1432_v17, 0.0 }
 0x30b   : > { %v944_v20 = vsub.f32 %v935_v1, %v943_v18  ;;  %731 = vadd.xlane.f32.xlu0 %v730_v19 }
 0x30d   : > { %v945_v21 = vmul.f32 1.442695, %v944_v20 }
 0x30f   : > { %1435 = vpow2.f32 %v945_v21 }
 0x311   : > { %v1434_v22 = vpop.eup %1433 }
 0x312   : > { %v839_v23 = vsel %vm616_vm3, %v1434_v22, 0.0 }
 0x313   : > { %840 = vadd.xlane.f32.xlu1 %v839_v23 }
 0x319   : > { %v1436_v24 = vpop.eup %1435 }
 0x31a   : > { %v947_v25 = vsel %vm616_vm3, %v1436_v24, 0.0 }
 0x31b   : > { %948 = vadd.xlane.f32.xlu0 %v947_v25 }
 0x324   : > { %953 = vrot.lane.b32.xlu1 %v568_v53, %s1564_s19  ;;  %s1475_s19 = scalar_lea.vmem %s1859_s22, 128 }
 0x325   : > { %p1476_p8 = scmp.ne.s32.totalorder %s1859_s22, %s1475_s19 }
 0x326   : > { %v625_v26 = vpop.xlane.xlu1 %624 }
 0x327   : > { %1437 = vrcp.f32 %v625_v26  ;;  %p1477_p0 = pnand %p1476_p8, %p1925_p11 }
 0x329   : > { %p1478_p7 = pneg %p1477_p0 }
 0x32a   : > { %v738_v30 = vpop.permute.xlu1 %737 }
 0x331   : > { %v1438_v27 = vpop.eup %1437  ;;  %845 = vrot.lane.b32.xlu0 %v568_v53, %s1562_s23  ;;  %s1565_s23 = smov 4   ;;  %v1428_v53 = vld [vmem:[%s1912_s5] sm:$0xff]  }
 0x332   : > { %v627_v28 = vmul.f32 %v1438_v27, %v1430_v9  ;;  %1347 = vmatpush3.bf16.msra.mxu1 %v1428_v53 }
 0x334   : > { %v628_v29 = vpack.c.bf16 %v627_v28, %v627_v28 }
 0x336   : > { %1307 = vmatmul.mubr.msk.bf16.vlgmr.msra.gmra.mrb[8].mxu0 %vm616_vm3, %v628_v29 }
 0x337   : > { %1317 = vmatpush3.bf16.msra.mxu0 %v738_v30  ;;  %1318 = vmatprep.mubr.msk.bf16.mxu0 %vm1561_vm0, %v1560_v0 }
 0x338   : > { %1328 = vmatprep.subr.bf16.mxu0 %v1560_v0 }
 0x398   : > { %v732_v31 = vpop.xlane.xlu0 %731 }
 0x399   : > { %1439 = vrcp.f32 %v732_v31 }
 0x3a0   : > { %v841_v32 = vpop.xlane.xlu1 %840 }
 0x3a1   : > { %1441 = vrcp.f32 %v841_v32 }
 0x3a3   : > { %v1440_v33 = vpop.eup %1439 }
 0x3a4   : > { %v734_v34 = vmul.f32 %v1440_v33, %v1432_v17  ;;  %v954_v41 = vpop.permute.xlu1 %953 }
 0x3a6   : > { %v735_v35 = vpack.c.bf16 %v734_v34, %v734_v34 }
 0x3a8   : > { %v949_v36 = vpop.xlane.xlu0 %948  ;;  %1319 = vmatmul.mubr.msk.bf16.vlgmr.msra.gmra.mrb[12].mxu0 %vm616_vm3, %v735_v35 }
 0x3a9   : > { %1443 = vrcp.f32 %v949_v36  ;;  %1330 = vmatprep.mubr.msk.bf16.mxu0 %vm1561_vm0, %v1560_v0 }
 0x3ab   : > { %v1442_v37 = vpop.eup %1441 }
 0x3ac   : > { %v843_v38 = vmul.f32 %v1442_v37, %v1434_v22  ;;  %v846_v39 = vpop.permute.xlu0 %845 }
 0x3ad   : > { %1329 = vmatpush3.bf16.msra.mxu0 %v846_v39 }
 0x3ae   : > { %v844_v40 = vpack.c.bf16 %v843_v38, %v843_v38  ;;  %1340 = vmatprep.subr.bf16.mxu0 %v1560_v0 }
 0x3b0   : > { %1331 = vmatmul.mubr.msk.bf16.vlgmr.msra.gmra.mrb[16].mxu0 %vm616_vm3, %v844_v40 }
 0x3b1   : > { %1341 = vmatpush3.bf16.msra.mxu0 %v954_v41  ;;  %1342 = vmatprep.mubr.msk.bf16.mxu0 %vm1561_vm0, %v1560_v0 }
 0x3b3   : > { %v1444_v42 = vpop.eup %1443 }
 0x3b4   : > { %v951_v43 = vmul.f32 %v1444_v42, %v1436_v24 }
 0x3b6   : > { %v952_v44 = vpack.c.bf16 %v951_v43, %v951_v43 }
 0x3b8   : > { %1343 = vmatmul.mubr.msk.bf16.vlgmr.msra.gmra.mrb[20].mxu0 %vm616_vm3, %v952_v44 }
 0x409   : > { %v666_v45 = vpop.f32.mrb[8].mxu0 }
 0x40a   : > { %v1308_v46 = vpop.f32.mrb[9].mxu0 }
 0x40b   : > { %v669_v47 = vpop.f32.mrb[10].mxu0 }
 0x40c   : > { %v1309_v48 = vpop.f32.mrb[11].mxu0 }
 0x47b   : > { %v777_v49 = vpop.f32.mrb[12].mxu0 }
 0x47c   : > { %1000 = vrot.lane.b32.xlu1 %v777_v49, %s1565_s23  ;;  %v1320_v50 = vpop.f32.mrb[13].mxu0 }
 0x47d   : > { %v780_v51 = vpop.f32.mrb[14].mxu0 }
 0x47e   : > { %v1321_v52 = vpop.f32.mrb[15].mxu0 }
 0x483   : > { %v885_v0 = vpop.f32.mrb[16].mxu0 }
 0x484   : > { %1004 = vrot.lane.b32.xlu0 %v885_v0, %s1566_s20  ;;  %v1332_v54 = vpop.f32.mrb[17].mxu0  ;;  %s1568_s20 = smov [#allocation5]  }
 0x485   : > { %v888_v55 = vpop.f32.mrb[18].mxu0 }
 0x486   : > { %v1333_v56 = vpop.f32.mrb[19].mxu0 }
 0x48b   : > { %v993_v57 = vpop.f32.mrb[20].mxu0 }
 0x48c   : > { %1008 = vrot.lane.b32.xlu1 %v993_v57, %s1567_s30  ;;  %v1344_v58 = vpop.f32.mrb[21].mxu0  ;;  %s1479_s30 = sshll.u32 %s1568_s20, 4  ;;  %s1480_s30 = int_to_ptr.vmem [resolvable:$false] %s1479_s30 }
 0x48d   : > { %v996_v59 = vpop.f32.mrb[22].mxu0  ;;  %s1481_s10 = scalar_lea.vmem %s1480_s30, 256  ;;  %p1482_p13 = scmp.lt.s32.totalorder %s1859_s22, %s1480_s30 }
 0x48e   : > { %v1345_v60 = vpop.f32.mrb[23].mxu0  ;;  %p1483_p3 = scmp.lt.s32.totalorder %s1481_s10, %s1475_s19 }
 0x490   : > { %p1484_p6 = por %p1483_p3, %p1482_p13 }
 0x492   : > { %p1485_p4 = pnand %p1484_p6, %p1478_p7 }
 0x4ee   : > { %v1001_v61 = vpop.permute.xlu1 %1000 }
 0x4ef   : > { %v1011_v63 = vsel %vm569_vm2, %v666_v45, %v1001_v61 }
 0x4f6   : > { %v1005_v62 = vpop.permute.xlu0 %1004 }
 0x4f7   : > { %v1013_v1 = vsel %vm1012_vm4, %v1011_v63, %v1005_v62 }
 0x4fe   : > { %v1009_v2 = vpop.permute.xlu1 %1008 }
 0x4ff   : > { %v1015_v3 = vsel %vm1014_vm5, %v1013_v1, %v1009_v2 }
 0x500   : > { %v1016_v4 = vpack.c.bf16 %v1015_v3, %v1015_v3 }
 0x502   : > { %1349 = vmatmul.mubr.msk.bf16.vlgmr.msra.gmra.mrb[20].mxu1 %vm616_vm3, %v1016_v4 }
 0x5d5   : > { %v1069_v6 = vpop.f32.mrb[20].mxu1 }
 0x5d6   : > { %v1070_v7 = vadd.f32 %v1238_v5, %v1069_v6  ;;  %v1350_v8 = vpop.f32.mrb[21].mxu1 }
 0x5d7   : > { %v1072_v9 = vpop.f32.mrb[22].mxu1 }
 0x5d8   : > { %v1351_v10 = vpop.f32.mrb[23].mxu1  ;;  %1075 = vst.msk [vmem:[%s340_s17] sm:$0xff] %vm383_vm1, %v1070_v7 }
 0x5d9   : > { %1488 = shalt.err (!%p1485_p4)
}
 0x5da   : > { %s1489_s12 = scalar_lea.hbm %s1857_s18, 128  ;;  %s1493_s8 = scalar_lea.hbm %s1914_s7, 256 }
 0x5db   : > { %p1490_p10 = scmp.ne.s32.totalorder %s1857_s18, %s1489_s12  ;;  %p1494_p2 = scmp.lt.u32.totalorder %s1857_s18, %s1914_s7 }
 0x5dc   : > { %p1495_p5 = scmp.lt.u32.totalorder %s1493_s8, %s1489_s12  ;;  %p1497_p8 = scmp.lt.u32.totalorder %s1489_s12, %s1857_s18 }
 0x5dd   : > { %p1491_p12 = pnand %p1490_p10, %p1925_p11 }
 0x5de   : > { %p1496_p9 = por %p1495_p5, %p1494_p2 }
 0x5df   : > { %p1492_p1 = pneg %p1491_p12 }
 0x5e0   : > { %p1498_p0 = por %p1497_p8, %p1496_p9 }
 0x5e2   : > { %p1499_p7 = pnand %p1498_p0, %p1492_p1 }
 0x5e4   : > { %1502 = shalt.err (!%p1499_p7)
}
 0x5e5   : > { %1354 = dma.vmem_to_hbm [thread:$0]  (%p1925_p11), %s1859_s22, 128, %s1857_s18, %s1077_s27  }
 0x5e6 PF: > { %s1103_s23 = sand.u32 1, %s1537_s24   ;;  %p1926_p13 = scmp.ne.s32.totalorder %s1920_s16, 0 }
 0x5e7   : > { %p1927_p3 = scmp.ge.s32.totalorder %s1557_s29, 2  ;;  %s1104_s19 = scalar_lea.sflag [#allocation4], %s1103_s23 }
 0x5e9   : > { %p1361_p6 = pnand %p1927_p3, %p1926_p13 }
 0x5eb   : > { %1532 = dma.done.wait (!%p1361_p6), %s1104_s19, 128  }
 0x5ec   : > { %1534 = vsyncadd (!%p1361_p6), %s1104_s19, 4294967168  ;;  %s23_s29 = sadd.s32 1, %s1557_s29   ;;  %s1928_s24 = smov %s1541_s25 }
 0x5ed   : > { %p20_p4 = scmp.ge.s32.totalorder %s23_s29, 4   ;;  %s1929_s25 = smov %s1545_s26 }
 0x5ee   : > { %s1930_s26 = smov %s1665_s15  ;;  %s1931_s27 = smov %s1553_s28 }
 0x5ef   : > { %s1932_s28 = smov %s1934_s9  ;;  %22 = sbr.rel (!%p20_p4) target bundleno = 6 (0x6), region = 103 }
 0x5f6   :  { %1109 = vsyncpa [#allocation3], 1 }
 0x5f7   :  { %1111 = vsyncpa [#allocation3 + $0x1], 1 }
 0x5f8   :  { %1112 = vsyncpa [#allocation4], 1 }
 0x5f9   :  { %1114 = vsyncpa [#allocation4 + $0x1], 1 }

</bundles_post_ra>
